<compile_context>
chip_gen: v6e
topology: v6e:2x2x1
jax: 0.10.0
libtpu: 0.0.40
codegen_flags: <defaults>
</compile_context>

<pallas_src>
import jax
import jax.numpy as jnp
from jax.experimental import pallas as pl
from jax.experimental.pallas import tpu as pltpu


def _round_up(x, m):
    return (x + m - 1) // m * m


def _vmem_capacity_bytes():
    """Per-core VMEM capacity, with a conservative (v7x) fallback."""
    try:
        info = pltpu.get_tpu_info()
        cap = getattr(info, "vmem_capacity_bytes", None)
        if cap:
            return int(cap)
    except Exception:
        pass
    return 64 << 20


def _choose_l_tile(L, B, per_l_bytes, budget_bytes, lane_tiled):
    """Largest time-tile under `budget_bytes`.

    If `lane_tiled`, L sits on the lane dim of the blocks, so the tile must be
    a multiple of 128 or equal to L (the (8,128) BlockSpec rule).  Also shrink
    the tile when the parallel grid would otherwise have < 2 units, so both
    v7x TensorCores get work (measured no-op on 1-TC v5e/v6e).
    """
    if L * per_l_bytes <= budget_bytes:
        lt = L
    else:
        lt = max(1, budget_bytes // max(per_l_bytes, 1))
        if lane_tiled:
            lt = max(128, (lt // 128) * 128)
        lt = min(lt, L)
    if B * pl.cdiv(L, lt) < 2:
        half = -(-L // 2)
        if lane_tiled:
            half = _round_up(half, 128)
        if half < L:
            lt = half
    return lt


# ---------------------------------------------------------------------------
# Small/medium graph path (V, W <= 128): native layout, VPU contraction.
# ---------------------------------------------------------------------------
def _dynconv_vpu_kernel(x_ref, a_ref, o_ref):
    # x_ref: (1, C, V, Lt)   a_ref: (1, V, W, Lt)   o_ref: (1, C, W, Lt)
    xb = x_ref[0]                       # (C, V, Lt)
    ab = a_ref[0]                       # (V, W, Lt)
    V = xb.shape[1]
    acc = None
    for v in range(V):                  # short, fully unrolled contraction
        xv = xb[:, v, :].astype(jnp.float32)          # (C, Lt)
        av = ab[v, :, :].astype(jnp.float32)          # (W, Lt)
        term = xv[:, None, :] * av[None, :, :]        # (C, W, Lt)  (VPU)
        acc = term if acc is None else acc + term
    o_ref[0] = acc.astype(o_ref.dtype)


# ---------------------------------------------------------------------------
# Big-graph path (V or W > 128): l-major lane-dense MXU batched matmul.
# ---------------------------------------------------------------------------
def _dynconv_mxu_kernel(x_ref, a_ref, o_ref):
    # x_ref: (1, Lt, Cp, Vp)   a_ref: (1, Lt, Vp, Wp)   o_ref: (1, Lt, Cp, Wp)
    out = jnp.einsum('lcv,lvw->lcw', x_ref[0], a_ref[0],
                     preferred_element_type=jnp.float32)
    o_ref[0] = out.astype(o_ref.dtype)


def dy_nconv(x, adj, *, compute_dtype=None, force_mxu=False):
    """x: (B, C, V, L), adj: (B, V, W, L) -> (B, C, W, L).

    Equivalent to torch.einsum('ncvl,nvwl->ncwl', (x, adj)).contiguous().
    """
    B, C, V, L = x.shape
    Ba, Va, W, La = adj.shape
    assert Ba == B and Va == V and La == L, (x.shape, adj.shape)

    out_dtype = x.dtype
    if compute_dtype is not None and jnp.dtype(compute_dtype) != x.dtype:
        # NOTE: this cast is an extra HBM pass; for the full bandwidth win,
        # feed bf16 x/adj directly from the producer instead.
        x = x.astype(compute_dtype)
        adj = adj.astype(compute_dtype)
    cdtype = jnp.dtype(x.dtype)
    itemsize = cdtype.itemsize

    vmem_cap = _vmem_capacity_bytes()
    # total double-buffered working-set budget / scoped-VMEM ceiling
    budget = min(int(0.45 * vmem_cap), 56 << 20)
    vmem_limit = int(min(max(int(0.75 * vmem_cap), 32 << 20), 96 << 20))

    out_bytes = B * C * W * L * jnp.dtype(out_dtype).itemsize
    cost = pl.CostEstimate(
        flops=int(2 * B * C * V * W * L),
        transcendentals=0,
        bytes_accessed=int(x.size * itemsize + adj.size * itemsize + out_bytes),
    )

    use_vpu = (not force_mxu) and (V <= 128) and (W <= 128)

    if use_vpu:
        # native layout, no padding, no wrapper passes
        per_l = 2 * (C * V + V * W + C * W) * itemsize + C * W * 4
        L_TILE = _choose_l_tile(L, B, per_l, budget, lane_tiled=True)
        grid = (B, pl.cdiv(L, L_TILE))

        return pl.pallas_call(
            _dynconv_vpu_kernel,
            out_shape=jax.ShapeDtypeStruct((B, C, W, L), out_dtype),
            grid_spec=pltpu.PrefetchScalarGridSpec(
                num_scalar_prefetch=0,
                grid=grid,
                in_specs=[
                    pl.BlockSpec((1, C, V, L_TILE), lambda b, t: (b, 0, 0, t)),
                    pl.BlockSpec((1, V, W, L_TILE), lambda b, t: (b, 0, 0, t)),
                ],
                out_specs=pl.BlockSpec((1, C, W, L_TILE),
                                       lambda b, t: (b, 0, 0, t)),
            ),
            compiler_params=pltpu.CompilerParams(
                dimension_semantics=("parallel", "parallel"),
                vmem_limit_bytes=vmem_limit,
            ),
            cost_estimate=cost,
        )(x, adj)

    # ------------------- big-graph MXU path -------------------------------
    # TODO(synk): fold these transposes/pads into the kernel (in-VMEM
    # einshape + in-kernel V-tail zeroing) so big-graph calls also avoid the
    # extra HBM passes.
    C_pad = _round_up(C, 8)      # sublane alignment of x/out tiles (no-op for C=32)
    V_pad = _round_up(V, 128)    # zero-padded contraction dim (keeps result exact)
    W_pad = _round_up(W, 128)    # lane-dense output

    xt = jnp.transpose(x, (0, 3, 1, 2))      # (B, L, C, V)
    at = jnp.transpose(adj, (0, 3, 1, 2))    # (B, L, V, W)
    xt = jnp.pad(xt, ((0, 0), (0, 0), (0, C_pad - C), (0, V_pad - V)))
    at = jnp.pad(at, ((0, 0), (0, 0), (0, V_pad - V), (0, W_pad - W)))

    per_l = (2 * (C_pad * V_pad + V_pad * W_pad + C_pad * W_pad) * itemsize
             + C_pad * W_pad * 4)
    L_TILE = _choose_l_tile(L, B, per_l, budget, lane_tiled=False)
    grid = (B, pl.cdiv(L, L_TILE))

    out_pad = pl.pallas_call(
        _dynconv_mxu_kernel,
        out_shape=jax.ShapeDtypeStruct((B, L, C_pad, W_pad), out_dtype),
        grid_spec=pltpu.PrefetchScalarGridSpec(
            num_scalar_prefetch=0,
            grid=grid,
            in_specs=[
                pl.BlockSpec((1, L_TILE, C_pad, V_pad),
                             lambda b, t: (b, t, 0, 0)),
                pl.BlockSpec((1, L_TILE, V_pad, W_pad),
                             lambda b, t: (b, t, 0, 0)),
            ],
            out_specs=pl.BlockSpec((1, L_TILE, C_pad, W_pad),
                                   lambda b, t: (b, t, 0, 0)),
        ),
        compiler_params=pltpu.CompilerParams(
            dimension_semantics=("parallel", "parallel"),
            vmem_limit_bytes=vmem_limit,
        ),
        cost_estimate=cost,
    )(xt, at)

    out = out_pad[:, :, :C, :W]
    return jnp.transpose(out, (0, 2, 3, 1))


if __name__ == "__main__":
    key = jax.random.PRNGKey(0)
    kx, ka = jax.random.split(key)

    B, C, V, L = 2, 4, 16, 16          # W == V (graph nodes)
    x = jax.random.normal(kx, (B, C, V, L), dtype=jnp.float32)
    adj = jax.random.normal(ka, (B, V, V, L), dtype=jnp.float32)

    # main (native-layout, zero-extra-pass) path
    out = dy_nconv(x, adj)
    jax.block_until_ready(out)

    ref = jnp.einsum('ncvl,nvwl->ncwl', x, adj)
    assert out.shape == ref.shape == (B, C, V, L)
    assert jnp.allclose(out, ref, atol=1e-3, rtol=1e-3), float(
        jnp.max(jnp.abs(out - ref)))

    # also exercise the big-graph MXU path once at the same small shapes
    out_mxu = dy_nconv(x, adj, force_mxu=True)
    jax.block_until_ready(out_mxu)
    assert jnp.allclose(out_mxu, ref, atol=1e-3, rtol=1e-3), float(
        jnp.max(jnp.abs(out_mxu - ref)))

    print("KERNEL_OK")
</pallas_src>

<mosaic_0001>
module attributes {stable_mosaic.version = 11 : i64} {
  func.func @_dynconv_vpu_kernel(%arg0: i32, %arg1: i32, %arg2: memref<1x4x16x16xf32, #tpu.memory_space<vmem>>, %arg3: memref<1x16x16x16xf32, #tpu.memory_space<vmem>>, %arg4: memref<1x4x16x16xf32, #tpu.memory_space<vmem>>) attributes {dimension_semantics = [#tpu.dimension_semantics<parallel>, #tpu.dimension_semantics<parallel>], iteration_bounds = array<i64: 2, 1>, scalar_prefetch = 0 : i64, scratch_operands = 0 : i64, tpu.core_type = #tpu.core_type<tc>, window_params = [{transform_indices = @transform_0, window_bounds = array<i64: 1, 4, 16, 16>}, {transform_indices = @transform_1, window_bounds = array<i64: 1, 16, 16, 16>}, {transform_indices = @transform_2, window_bounds = array<i64: 1, 4, 16, 16>}]} {
    %c0 = arith.constant 0 : index
    %c0_0 = arith.constant 0 : index
    %c0_1 = arith.constant 0 : index
    %c0_2 = arith.constant 0 : index
    %0 = vector.load %arg2[%c0, %c0_0, %c0_1, %c0_2] : memref<1x4x16x16xf32, #tpu.memory_space<vmem>>, vector<1x4x16x16xf32>
    %1 = vector.shape_cast %0 : vector<1x4x16x16xf32> to vector<4x16x16xf32>
    %c0_3 = arith.constant 0 : index
    %c0_4 = arith.constant 0 : index
    %c0_5 = arith.constant 0 : index
    %c0_6 = arith.constant 0 : index
    %2 = vector.load %arg3[%c0_3, %c0_4, %c0_5, %c0_6] : memref<1x16x16x16xf32, #tpu.memory_space<vmem>>, vector<1x16x16x16xf32>
    %3 = vector.shape_cast %2 : vector<1x16x16x16xf32> to vector<16x16x16xf32>
    %4 = vector.extract_strided_slice %1 {offsets = [0, 0, 0], sizes = [4, 1, 16], strides = [1, 1, 1]} : vector<4x16x16xf32> to vector<4x1x16xf32>
    %5 = vector.shape_cast %4 : vector<4x1x16xf32> to vector<4x16xf32>
    %6 = vector.extract_strided_slice %3 {offsets = [0, 0, 0], sizes = [1, 16, 16], strides = [1, 1, 1]} : vector<16x16x16xf32> to vector<1x16x16xf32>
    %7 = vector.shape_cast %6 : vector<1x16x16xf32> to vector<16x16xf32>
    %8 = vector.shape_cast %5 : vector<4x16xf32> to vector<4x1x16xf32>
    %9 = vector.shape_cast %7 : vector<16x16xf32> to vector<1x16x16xf32>
    %10 = vector.broadcast %8 : vector<4x1x16xf32> to vector<4x16x16xf32>
    %11 = vector.broadcast %9 : vector<1x16x16xf32> to vector<4x16x16xf32>
    %12 = arith.mulf %10, %11 : vector<4x16x16xf32>
    %13 = vector.extract_strided_slice %1 {offsets = [0, 1, 0], sizes = [4, 1, 16], strides = [1, 1, 1]} : vector<4x16x16xf32> to vector<4x1x16xf32>
    %14 = vector.shape_cast %13 : vector<4x1x16xf32> to vector<4x16xf32>
    %15 = vector.extract_strided_slice %3 {offsets = [1, 0, 0], sizes = [1, 16, 16], strides = [1, 1, 1]} : vector<16x16x16xf32> to vector<1x16x16xf32>
    %16 = vector.shape_cast %15 : vector<1x16x16xf32> to vector<16x16xf32>
    %17 = vector.shape_cast %14 : vector<4x16xf32> to vector<4x1x16xf32>
    %18 = vector.shape_cast %16 : vector<16x16xf32> to vector<1x16x16xf32>
    %19 = vector.broadcast %17 : vector<4x1x16xf32> to vector<4x16x16xf32>
    %20 = vector.broadcast %18 : vector<1x16x16xf32> to vector<4x16x16xf32>
    %21 = arith.mulf %19, %20 : vector<4x16x16xf32>
    %22 = arith.addf %12, %21 : vector<4x16x16xf32>
    %23 = vector.extract_strided_slice %1 {offsets = [0, 2, 0], sizes = [4, 1, 16], strides = [1, 1, 1]} : vector<4x16x16xf32> to vector<4x1x16xf32>
    %24 = vector.shape_cast %23 : vector<4x1x16xf32> to vector<4x16xf32>
    %25 = vector.extract_strided_slice %3 {offsets = [2, 0, 0], sizes = [1, 16, 16], strides = [1, 1, 1]} : vector<16x16x16xf32> to vector<1x16x16xf32>
    %26 = vector.shape_cast %25 : vector<1x16x16xf32> to vector<16x16xf32>
    %27 = vector.shape_cast %24 : vector<4x16xf32> to vector<4x1x16xf32>
    %28 = vector.shape_cast %26 : vector<16x16xf32> to vector<1x16x16xf32>
    %29 = vector.broadcast %27 : vector<4x1x16xf32> to vector<4x16x16xf32>
    %30 = vector.broadcast %28 : vector<1x16x16xf32> to vector<4x16x16xf32>
    %31 = arith.mulf %29, %30 : vector<4x16x16xf32>
    %32 = arith.addf %22, %31 : vector<4x16x16xf32>
    %33 = vector.extract_strided_slice %1 {offsets = [0, 3, 0], sizes = [4, 1, 16], strides = [1, 1, 1]} : vector<4x16x16xf32> to vector<4x1x16xf32>
    %34 = vector.shape_cast %33 : vector<4x1x16xf32> to vector<4x16xf32>
    %35 = vector.extract_strided_slice %3 {offsets = [3, 0, 0], sizes = [1, 16, 16], strides = [1, 1, 1]} : vector<16x16x16xf32> to vector<1x16x16xf32>
    %36 = vector.shape_cast %35 : vector<1x16x16xf32> to vector<16x16xf32>
    %37 = vector.shape_cast %34 : vector<4x16xf32> to vector<4x1x16xf32>
    %38 = vector.shape_cast %36 : vector<16x16xf32> to vector<1x16x16xf32>
    %39 = vector.broadcast %37 : vector<4x1x16xf32> to vector<4x16x16xf32>
    %40 = vector.broadcast %38 : vector<1x16x16xf32> to vector<4x16x16xf32>
    %41 = arith.mulf %39, %40 : vector<4x16x16xf32>
    %42 = arith.addf %32, %41 : vector<4x16x16xf32>
    %43 = vector.extract_strided_slice %1 {offsets = [0, 4, 0], sizes = [4, 1, 16], strides = [1, 1, 1]} : vector<4x16x16xf32> to vector<4x1x16xf32>
    %44 = vector.shape_cast %43 : vector<4x1x16xf32> to vector<4x16xf32>
    %45 = vector.extract_strided_slice %3 {offsets = [4, 0, 0], sizes = [1, 16, 16], strides = [1, 1, 1]} : vector<16x16x16xf32> to vector<1x16x16xf32>
    %46 = vector.shape_cast %45 : vector<1x16x16xf32> to vector<16x16xf32>
    %47 = vector.shape_cast %44 : vector<4x16xf32> to vector<4x1x16xf32>
    %48 = vector.shape_cast %46 : vector<16x16xf32> to vector<1x16x16xf32>
    %49 = vector.broadcast %47 : vector<4x1x16xf32> to vector<4x16x16xf32>
    %50 = vector.broadcast %48 : vector<1x16x16xf32> to vector<4x16x16xf32>
    %51 = arith.mulf %49, %50 : vector<4x16x16xf32>
    %52 = arith.addf %42, %51 : vector<4x16x16xf32>
    %53 = vector.extract_strided_slice %1 {offsets = [0, 5, 0], sizes = [4, 1, 16], strides = [1, 1, 1]} : vector<4x16x16xf32> to vector<4x1x16xf32>
    %54 = vector.shape_cast %53 : vector<4x1x16xf32> to vector<4x16xf32>
    %55 = vector.extract_strided_slice %3 {offsets = [5, 0, 0], sizes = [1, 16, 16], strides = [1, 1, 1]} : vector<16x16x16xf32> to vector<1x16x16xf32>
    %56 = vector.shape_cast %55 : vector<1x16x16xf32> to vector<16x16xf32>
    %57 = vector.shape_cast %54 : vector<4x16xf32> to vector<4x1x16xf32>
    %58 = vector.shape_cast %56 : vector<16x16xf32> to vector<1x16x16xf32>
    %59 = vector.broadcast %57 : vector<4x1x16xf32> to vector<4x16x16xf32>
    %60 = vector.broadcast %58 : vector<1x16x16xf32> to vector<4x16x16xf32>
    %61 = arith.mulf %59, %60 : vector<4x16x16xf32>
    %62 = arith.addf %52, %61 : vector<4x16x16xf32>
    %63 = vector.extract_strided_slice %1 {offsets = [0, 6, 0], sizes = [4, 1, 16], strides = [1, 1, 1]} : vector<4x16x16xf32> to vector<4x1x16xf32>
    %64 = vector.shape_cast %63 : vector<4x1x16xf32> to vector<4x16xf32>
    %65 = vector.extract_strided_slice %3 {offsets = [6, 0, 0], sizes = [1, 16, 16], strides = [1, 1, 1]} : vector<16x16x16xf32> to vector<1x16x16xf32>
    %66 = vector.shape_cast %65 : vector<1x16x16xf32> to vector<16x16xf32>
    %67 = vector.shape_cast %64 : vector<4x16xf32> to vector<4x1x16xf32>
    %68 = vector.shape_cast %66 : vector<16x16xf32> to vector<1x16x16xf32>
    %69 = vector.broadcast %67 : vector<4x1x16xf32> to vector<4x16x16xf32>
    %70 = vector.broadcast %68 : vector<1x16x16xf32> to vector<4x16x16xf32>
    %71 = arith.mulf %69, %70 : vector<4x16x16xf32>
    %72 = arith.addf %62, %71 : vector<4x16x16xf32>
    %73 = vector.extract_strided_slice %1 {offsets = [0, 7, 0], sizes = [4, 1, 16], strides = [1, 1, 1]} : vector<4x16x16xf32> to vector<4x1x16xf32>
    %74 = vector.shape_cast %73 : vector<4x1x16xf32> to vector<4x16xf32>
    %75 = vector.extract_strided_slice %3 {offsets = [7, 0, 0], sizes = [1, 16, 16], strides = [1, 1, 1]} : vector<16x16x16xf32> to vector<1x16x16xf32>
    %76 = vector.shape_cast %75 : vector<1x16x16xf32> to vector<16x16xf32>
    %77 = vector.shape_cast %74 : vector<4x16xf32> to vector<4x1x16xf32>
    %78 = vector.shape_cast %76 : vector<16x16xf32> to vector<1x16x16xf32>
    %79 = vector.broadcast %77 : vector<4x1x16xf32> to vector<4x16x16xf32>
    %80 = vector.broadcast %78 : vector<1x16x16xf32> to vector<4x16x16xf32>
    %81 = arith.mulf %79, %80 : vector<4x16x16xf32>
    %82 = arith.addf %72, %81 : vector<4x16x16xf32>
    %83 = vector.extract_strided_slice %1 {offsets = [0, 8, 0], sizes = [4, 1, 16], strides = [1, 1, 1]} : vector<4x16x16xf32> to vector<4x1x16xf32>
    %84 = vector.shape_cast %83 : vector<4x1x16xf32> to vector<4x16xf32>
    %85 = vector.extract_strided_slice %3 {offsets = [8, 0, 0], sizes = [1, 16, 16], strides = [1, 1, 1]} : vector<16x16x16xf32> to vector<1x16x16xf32>
    %86 = vector.shape_cast %85 : vector<1x16x16xf32> to vector<16x16xf32>
    %87 = vector.shape_cast %84 : vector<4x16xf32> to vector<4x1x16xf32>
    %88 = vector.shape_cast %86 : vector<16x16xf32> to vector<1x16x16xf32>
    %89 = vector.broadcast %87 : vector<4x1x16xf32> to vector<4x16x16xf32>
    %90 = vector.broadcast %88 : vector<1x16x16xf32> to vector<4x16x16xf32>
    %91 = arith.mulf %89, %90 : vector<4x16x16xf32>
    %92 = arith.addf %82, %91 : vector<4x16x16xf32>
    %93 = vector.extract_strided_slice %1 {offsets = [0, 9, 0], sizes = [4, 1, 16], strides = [1, 1, 1]} : vector<4x16x16xf32> to vector<4x1x16xf32>
    %94 = vector.shape_cast %93 : vector<4x1x16xf32> to vector<4x16xf32>
    %95 = vector.extract_strided_slice %3 {offsets = [9, 0, 0], sizes = [1, 16, 16], strides = [1, 1, 1]} : vector<16x16x16xf32> to vector<1x16x16xf32>
    %96 = vector.shape_cast %95 : vector<1x16x16xf32> to vector<16x16xf32>
    %97 = vector.shape_cast %94 : vector<4x16xf32> to vector<4x1x16xf32>
    %98 = vector.shape_cast %96 : vector<16x16xf32> to vector<1x16x16xf32>
    %99 = vector.broadcast %97 : vector<4x1x16xf32> to vector<4x16x16xf32>
    %100 = vector.broadcast %98 : vector<1x16x16xf32> to vector<4x16x16xf32>
    %101 = arith.mulf %99, %100 : vector<4x16x16xf32>
    %102 = arith.addf %92, %101 : vector<4x16x16xf32>
    %103 = vector.extract_strided_slice %1 {offsets = [0, 10, 0], sizes = [4, 1, 16], strides = [1, 1, 1]} : vector<4x16x16xf32> to vector<4x1x16xf32>
    %104 = vector.shape_cast %103 : vector<4x1x16xf32> to vector<4x16xf32>
    %105 = vector.extract_strided_slice %3 {offsets = [10, 0, 0], sizes = [1, 16, 16], strides = [1, 1, 1]} : vector<16x16x16xf32> to vector<1x16x16xf32>
    %106 = vector.shape_cast %105 : vector<1x16x16xf32> to vector<16x16xf32>
    %107 = vector.shape_cast %104 : vector<4x16xf32> to vector<4x1x16xf32>
    %108 = vector.shape_cast %106 : vector<16x16xf32> to vector<1x16x16xf32>
    %109 = vector.broadcast %107 : vector<4x1x16xf32> to vector<4x16x16xf32>
    %110 = vector.broadcast %108 : vector<1x16x16xf32> to vector<4x16x16xf32>
    %111 = arith.mulf %109, %110 : vector<4x16x16xf32>
    %112 = arith.addf %102, %111 : vector<4x16x16xf32>
    %113 = vector.extract_strided_slice %1 {offsets = [0, 11, 0], sizes = [4, 1, 16], strides = [1, 1, 1]} : vector<4x16x16xf32> to vector<4x1x16xf32>
    %114 = vector.shape_cast %113 : vector<4x1x16xf32> to vector<4x16xf32>
    %115 = vector.extract_strided_slice %3 {offsets = [11, 0, 0], sizes = [1, 16, 16], strides = [1, 1, 1]} : vector<16x16x16xf32> to vector<1x16x16xf32>
    %116 = vector.shape_cast %115 : vector<1x16x16xf32> to vector<16x16xf32>
    %117 = vector.shape_cast %114 : vector<4x16xf32> to vector<4x1x16xf32>
    %118 = vector.shape_cast %116 : vector<16x16xf32> to vector<1x16x16xf32>
    %119 = vector.broadcast %117 : vector<4x1x16xf32> to vector<4x16x16xf32>
    %120 = vector.broadcast %118 : vector<1x16x16xf32> to vector<4x16x16xf32>
    %121 = arith.mulf %119, %120 : vector<4x16x16xf32>
    %122 = arith.addf %112, %121 : vector<4x16x16xf32>
    %123 = vector.extract_strided_slice %1 {offsets = [0, 12, 0], sizes = [4, 1, 16], strides = [1, 1, 1]} : vector<4x16x16xf32> to vector<4x1x16xf32>
    %124 = vector.shape_cast %123 : vector<4x1x16xf32> to vector<4x16xf32>
    %125 = vector.extract_strided_slice %3 {offsets = [12, 0, 0], sizes = [1, 16, 16], strides = [1, 1, 1]} : vector<16x16x16xf32> to vector<1x16x16xf32>
    %126 = vector.shape_cast %125 : vector<1x16x16xf32> to vector<16x16xf32>
    %127 = vector.shape_cast %124 : vector<4x16xf32> to vector<4x1x16xf32>
    %128 = vector.shape_cast %126 : vector<16x16xf32> to vector<1x16x16xf32>
    %129 = vector.broadcast %127 : vector<4x1x16xf32> to vector<4x16x16xf32>
    %130 = vector.broadcast %128 : vector<1x16x16xf32> to vector<4x16x16xf32>
    %131 = arith.mulf %129, %130 : vector<4x16x16xf32>
    %132 = arith.addf %122, %131 : vector<4x16x16xf32>
    %133 = vector.extract_strided_slice %1 {offsets = [0, 13, 0], sizes = [4, 1, 16], strides = [1, 1, 1]} : vector<4x16x16xf32> to vector<4x1x16xf32>
    %134 = vector.shape_cast %133 : vector<4x1x16xf32> to vector<4x16xf32>
    %135 = vector.extract_strided_slice %3 {offsets = [13, 0, 0], sizes = [1, 16, 16], strides = [1, 1, 1]} : vector<16x16x16xf32> to vector<1x16x16xf32>
    %136 = vector.shape_cast %135 : vector<1x16x16xf32> to vector<16x16xf32>
    %137 = vector.shape_cast %134 : vector<4x16xf32> to vector<4x1x16xf32>
    %138 = vector.shape_cast %136 : vector<16x16xf32> to vector<1x16x16xf32>
    %139 = vector.broadcast %137 : vector<4x1x16xf32> to vector<4x16x16xf32>
    %140 = vector.broadcast %138 : vector<1x16x16xf32> to vector<4x16x16xf32>
    %141 = arith.mulf %139, %140 : vector<4x16x16xf32>
    %142 = arith.addf %132, %141 : vector<4x16x16xf32>
    %143 = vector.extract_strided_slice %1 {offsets = [0, 14, 0], sizes = [4, 1, 16], strides = [1, 1, 1]} : vector<4x16x16xf32> to vector<4x1x16xf32>
    %144 = vector.shape_cast %143 : vector<4x1x16xf32> to vector<4x16xf32>
    %145 = vector.extract_strided_slice %3 {offsets = [14, 0, 0], sizes = [1, 16, 16], strides = [1, 1, 1]} : vector<16x16x16xf32> to vector<1x16x16xf32>
    %146 = vector.shape_cast %145 : vector<1x16x16xf32> to vector<16x16xf32>
    %147 = vector.shape_cast %144 : vector<4x16xf32> to vector<4x1x16xf32>
    %148 = vector.shape_cast %146 : vector<16x16xf32> to vector<1x16x16xf32>
    %149 = vector.broadcast %147 : vector<4x1x16xf32> to vector<4x16x16xf32>
    %150 = vector.broadcast %148 : vector<1x16x16xf32> to vector<4x16x16xf32>
    %151 = arith.mulf %149, %150 : vector<4x16x16xf32>
    %152 = arith.addf %142, %151 : vector<4x16x16xf32>
    %153 = vector.extract_strided_slice %1 {offsets = [0, 15, 0], sizes = [4, 1, 16], strides = [1, 1, 1]} : vector<4x16x16xf32> to vector<4x1x16xf32>
    %154 = vector.shape_cast %153 : vector<4x1x16xf32> to vector<4x16xf32>
    %155 = vector.extract_strided_slice %3 {offsets = [15, 0, 0], sizes = [1, 16, 16], strides = [1, 1, 1]} : vector<16x16x16xf32> to vector<1x16x16xf32>
    %156 = vector.shape_cast %155 : vector<1x16x16xf32> to vector<16x16xf32>
    %157 = vector.shape_cast %154 : vector<4x16xf32> to vector<4x1x16xf32>
    %158 = vector.shape_cast %156 : vector<16x16xf32> to vector<1x16x16xf32>
    %159 = vector.broadcast %157 : vector<4x1x16xf32> to vector<4x16x16xf32>
    %160 = vector.broadcast %158 : vector<1x16x16xf32> to vector<4x16x16xf32>
    %161 = arith.mulf %159, %160 : vector<4x16x16xf32>
    %162 = arith.addf %152, %161 : vector<4x16x16xf32>
    %c0_7 = arith.constant 0 : index
    %c0_8 = arith.constant 0 : index
    %c0_9 = arith.constant 0 : index
    %c0_10 = arith.constant 0 : index
    %163 = vector.load %arg4[%c0_7, %c0_8, %c0_9, %c0_10] : memref<1x4x16x16xf32, #tpu.memory_space<vmem>>, vector<1x4x16x16xf32>
    %164 = vector.shape_cast %163 : vector<1x4x16x16xf32> to vector<4x16x16xf32>
    %165 = vector.shape_cast %162 : vector<4x16x16xf32> to vector<1x4x16x16xf32>
    tpu.vector_store %arg4[%c0_7, %c0_8, %c0_9, %c0_10], %165 {strides = array<i32>} : memref<1x4x16x16xf32, #tpu.memory_space<vmem>>, vector<1x4x16x16xf32>,
    return
  }
  func.func @transform_0(%arg0: i32, %arg1: i32) -> (i32, i32, i32, i32) {
    %c0_i32 = arith.constant 0 : i32
    %c0_i32_0 = arith.constant 0 : i32
    %c0_i32_1 = arith.constant 0 : i32
    return %arg0, %c0_i32, %c0_i32_0, %arg1 : i32, i32, i32, i32
  }
  func.func @transform_1(%arg0: i32, %arg1: i32) -> (i32, i32, i32, i32) {
    %c0_i32 = arith.constant 0 : i32
    %c0_i32_0 = arith.constant 0 : i32
    %c0_i32_1 = arith.constant 0 : i32
    return %arg0, %c0_i32, %c0_i32_0, %arg1 : i32, i32, i32, i32
  }
  func.func @transform_2(%arg0: i32, %arg1: i32) -> (i32, i32, i32, i32) {
    %c0_i32 = arith.constant 0 : i32
    %c0_i32_0 = arith.constant 0 : i32
    %c0_i32_1 = arith.constant 0 : i32
    return %arg0, %c0_i32, %c0_i32_0, %arg1 : i32, i32, i32, i32
  }
}

</mosaic_0001>

<bundles_post_ra>
// kernel: tpu_custom_call.1
= control target key start
LH: loop header
LB: loop body
LE: loop exit
PB: predicated region body
PF: predicated region fallthrough
CT: control target
= control target key end

     0   :  { %7 = vsyncpa [#allocation3], 0  ;;  %s1805_s0 = inlined_call_operand.hbm [shape: f32[2,4,16,16], index: 0, kind: input, shape index: {}]   ;;  %s1806_s1 = inlined_call_operand.hbm [shape: f32[2,16,16,16], index: 1, kind: input, shape index: {}]   ;;  %s1807_s2 = inlined_call_operand.hbm [shape: f32[2,4,16,16], index: 2, kind: output, shape index: {}]  }
   0x1   :  { %9 = vsyncpa [#allocation3 + $0x1], 0 }
   0x2   :  { %10 = vsyncpa [#allocation6], 0 }
   0x3   :  { %12 = vsyncpa [#allocation6 + $0x1], 0 }
   0x4   :  { %13 = vsyncpa [#allocation4], 0 }
   0x5   :  { %15 = vsyncpa [#allocation4 + $0x1], 0  ;;  %s1157_s9 = smov 0   ;;  %s1159_s10 = smov 0  }
   0x6   :  { %s1161_s11 = smov 0   ;;  %s1163_s12 = smov 0  }
   0x7   :  { %s1165_s13 = smov 0   ;;  %s1167_s14 = smov 0  }
   0x8 LB: > { %s900_s15 = sadd.s32 4294967295, %s1133_s14   ;;  %s901_s16 = sadd.s32 4294967294, %s1133_s14   ;;  %s1133_s14 = sphi %s1167_s14, %s21_s14   ;;  %s1129_s13 = sphi %s1165_s13, %s1926_s13   ;;  %s1125_s12 = sphi %s1163_s12, %s1925_s12   ;;  %s1121_s11 = sphi %s1161_s11, %s1924_s11   ;;  %s1117_s10 = sphi %s1159_s10, %s1923_s10   ;;  %s1113_s9 = sphi %s1157_s9, %s1922_s9  }
   0x9   : > { %s33_s17 = sadd.s32 1, %s1129_s13  ;;  %s42_s18 = sadd.s32 1, %s1121_s11 }
   0xa   : > { %p35_p0 = scmp.ge.s32.totalorder %s33_s17, 2  ;;  %p49_p1 = scmp.ne.s32.totalorder %s1121_s11, %s1117_s10 }
   0xb   : > { %p50_p2 = scmp.eq.s32.totalorder %s1133_s14, 0  ;;  %p55_p3 = scmp.ne.s32.totalorder %s1117_s10, %s1113_s9 }
   0xc   : > { %s1928_s17 = smov (%p35_p0, %s33_s17), 0  ;;  %p56_p5 = scmp.eq.s32.totalorder %s900_s15, 0 }
   0xd   : > { %p1198_p4 = por %p50_p2, %p49_p1  ;;  %s37_s20 = ssub.s32 %s1129_s13, %s1928_s17 }
   0xe   : > { %p109_p6 = scmp.eq.s32.totalorder %s900_s15, 1  ;;  %p40_p7 = scmp.eq.s32.totalorder %s37_s20, 0 }
   0xf   : > { %p1204_p8 = por %p56_p5, %p55_p3  ;;  %p115_p10 = scmp.eq.s32.totalorder %s901_s16, 1 }
  0x10   : > { %p1208_p9 = por %p109_p6, %p49_p1  ;;  %p903_p12 = scmp.ge.s32.totalorder %s1133_s14, 2 }
  0x11   : > { %s1213_s23 = scalar_select %p40_p7, %s1121_s11, %s42_s18  }
  0x12   : > { %p1215_p11 = por %p115_p10, %p55_p3  ;;  %p939_p13 = scmp.lt.s32.totalorder %s1133_s14, 2 }
  0x13   : > { %s1222_s25 = sand.u32 1, %s1121_s11   ;;  %s919_s27 = sshll.u32 %s1129_s13, 10 }
  0x14   : > { %s904_s26 = sshll.u32 %s1222_s25, 6  ;;  %s146_s30 = scalar_lea.hbm %s1805_s0, %s919_s27 }
  0x15   : > { %s139_s3 = scalar_lea.vmem [#allocation2], %s904_s26  ;;  %p1231_p0 = pnand %p939_p13, %p1198_p4 }
  0x16   : > { %s147_s4 = sshll.u32 %s139_s3, 4  ;;  %p910_p1 = scmp.ge.s32.totalorder %s1133_s14, 1  ;;  %s148_s4 = int_to_ptr.vmem [resolvable:$true] %s147_s4 }
  0x17   : > { %s136_s6 = scalar_lea.sflag [#allocation3], %s1222_s25  ;;  %p995_p2 = pneg %p1231_p0 }
  0x18   : > { %s1006_s7 = scalar_lea.vmem %s148_s4, 1024  ;;  %s1135_s8 = smov [#allocation2]  }
  0x19   : > { %p1007_p3 = scmp.ne.s32.totalorder %s148_s4, %s1006_s7  ;;  %s1011_s15 = sshll.u32 %s1135_s8, 4  ;;  %s1012_s15 = int_to_ptr.vmem [resolvable:$false] %s1011_s15 }
  0x1a   : > { %s1013_s16 = scalar_lea.vmem %s1012_s15, 2048  ;;  %p1014_p4 = scmp.lt.s32.totalorder %s148_s4, %s1012_s15 }
  0x1b   : > { %p1009_p5 = pnand %p1007_p3, %p995_p2  ;;  %p1015_p7 = scmp.lt.s32.totalorder %s1013_s16, %s1006_s7 }
  0x1d   : > { %p1010_p6 = pneg %p1009_p5  ;;  %p1016_p10 = por %p1015_p7, %p1014_p4 }
  0x1f   : > { %p1017_p13 = pnand %p1016_p10, %p1010_p6 }
  0x21   : > { %1020 = shalt.err (!%p1017_p13)
}
  0x22   : > { %s1136_s18 = smov 128   ;;  %s1137_s19 = smov 8  }
  0x23   : > { %931 = dma.hbm_to_vmem [thread:$0]  (!%p1231_p0), %s146_s30, 1024, %s148_s4, %s136_s6, %s1136_s18, %s1136_s18, %s1137_s19  }
  0x24   : > { %p177_p3 = scmp.lt.s32.totalorder %s1133_s14, 3  ;;  %s907_s20 = sshll.u32 %s1222_s25, 8 }
  0x25   : > { %s920_s26 = sshll.u32 %s1129_s13, 12  ;;  %s161_s7 = scalar_lea.vmem [#allocation5], %s907_s20 }
  0x26   : > { %p1249_p5 = pnand %p910_p1, %p177_p3  ;;  %s168_s3 = scalar_lea.hbm %s1806_s1, %s920_s26 }
  0x27   : > { %s169_s8 = sshll.u32 %s161_s7, 4  ;;  %s158_s15 = scalar_lea.sflag [#allocation6], %s1222_s25  ;;  %s170_s8 = int_to_ptr.vmem [resolvable:$true] %s169_s8 }
  0x28   : > { %s1034_s16 = scalar_lea.vmem %s170_s8, 4096  ;;  %s1138_s30 = smov [#allocation5]  }
  0x29   : > { %p1035_p6 = scmp.ne.s32.totalorder %s170_s8, %s1034_s16  ;;  %s1039_s4 = sshll.u32 %s1138_s30, 4  ;;  %s1040_s4 = int_to_ptr.vmem [resolvable:$false] %s1039_s4 }
  0x2a   : > { %s1041_s6 = scalar_lea.vmem %s1040_s4, 8192  ;;  %p1042_p1 = scmp.lt.s32.totalorder %s170_s8, %s1040_s4 }
  0x2b   : > { %p1037_p4 = pnand %p1035_p6, %p995_p2  ;;  %p1043_p10 = scmp.lt.s32.totalorder %s1041_s6, %s1034_s16 }
  0x2d   : > { %p1038_p7 = pneg %p1037_p4  ;;  %p1044_p13 = por %p1043_p10, %p1042_p1 }
  0x2f   : > { %p1045_p3 = pnand %p1044_p13, %p1038_p7 }
  0x31   : > { %1048 = shalt.err (!%p1045_p3)
}
  0x32   : > { %934 = dma.hbm_to_vmem [thread:$0]  (!%p1231_p0), %s168_s3, 4096, %s170_s8, %s158_s15, %s1136_s18, %s1136_s18, %s1137_s19  }
  0x33   : > { %181 = sbr.rel (%p1249_p5) target bundleno = 177 (0xb1), region = 28 }
  0x38   : > { %s1265_s25 = sand.u32 1, %s1117_s10  }
  0x39   : > { %s911_s20 = sshll.u32 %s1265_s25, 6  ;;  %s184_s26 = scalar_lea.sflag [#allocation3], %s1265_s25 }
  0x3a   : > { %s1271_s28 = scalar_lea.vmem [#allocation2], %s911_s20 }
  0x3b   : > { %1100 = dma.done.wait (%p1204_p8), %s184_s26, 1024  }
  0x3c   : > { %1102 = vsyncadd (%p1204_p8), %s184_s26, 4294966272  ;;  %s912_s5 = sshll.u32 %s1265_s25, 8  ;;  %s193_s18 = scalar_lea.sflag [#allocation6], %s1265_s25 }
  0x3d   : > { %s1279_s19 = scalar_lea.vmem [#allocation5], %s912_s5 }
  0x3e   : > { %1104 = dma.done.wait (%p1204_p8), %s193_s18, 4096  }
  0x3f   : > { %1106 = vsyncadd (%p1204_p8), %s193_s18, 4294963200  ;;  %v262_v0 = vlaneseq  ;;  %v222_v8 = vld [vmem:[%s1271_s28] sm:$0xff]  ;;  %v1302_v10 = vld [vmem:[%s1279_s19 + $0x10] sm:$0xff]  ;;  %vm766_vm0 = vcmask 130048   ;;  %s1561_s21 = scalar_lea.vmem [#allocation7], %s911_s20  ;;  %s921_s29 = sshll.u32 %s1125_s12, 10 }
  0x40   : > { %v1299_v9 = vld [vmem:[%s1279_s19] sm:$0xff]  ;;  %1858 = vst [vmem:[#allocation13_spill] sm:$0xff] %v1302_v10  ;;  %v1312_v16 = vld [vmem:[%s1279_s19 + $0x30] sm:$0xff]  ;;  %v223_v24 = vld [vmem:[%s1271_s28 + $0x8] sm:$0xff]  ;;  %s790_s27 = sshll.u32 %s1561_s21, 4  ;;  %s1755_s8 = scalar_lea.hbm %s1807_s2, %s921_s29  ;;  %s1750_s27 = int_to_ptr.vmem [resolvable:$true] %s790_s27 }
  0x41   : > { %v263_v1 = vshrl.u32 %v262_v0, 7  ;;  %1857 = vst [vmem:[#allocation12_spill] sm:$0xff] %v1299_v9  ;;  %v1305_v11 = vld [vmem:[%s1279_s19 + $0x20] sm:$0xff]  ;;  %v1328_v26 = vld [vmem:[%s1279_s19 + $0x50] sm:$0xff]  ;;  %v1336_v31 = vld [vmem:[%s1279_s19 + $0x8] sm:$0xff]  ;;  %s776_s15 = scalar_lea.sflag [#allocation4], %s1265_s25 }
  0x42   : > { %1859 = vst [vmem:[#allocation14_spill] sm:$0xff] %v1305_v11  ;;  %v1325_v25 = vld [vmem:[%s1279_s19 + $0x40] sm:$0xff]  ;;  %v1339_v32 = vld [vmem:[%s1279_s19 + $0x18] sm:$0xff]  ;;  %v1345_v34 = vld [vmem:[%s1279_s19 + $0x70] sm:$0xff]  ;;  %s1049_s16 = scalar_lea.vmem %s1750_s27, 1024  ;;  %s1139_s12 = smov [#allocation7]  }
  0x43   : > { %v1285_v2 = vsub.s32 0, %v263_v1  ;;  %v1287_v3 = vsub.s32 1, %v263_v1  ;;  %v1289_v4 = vsub.s32 2, %v263_v1  ;;  %v1291_v5 = vsub.s32 3, %v263_v1  ;;  %v1342_v33 = vld [vmem:[%s1279_s19 + $0x60] sm:$0xff]  ;;  %v1351_v39 = vld [vmem:[%s1279_s19 + $0x28] sm:$0xff]  ;;  %p1050_p8 = scmp.ne.s32.totalorder %s1750_s27, %s1049_s16 }
  0x44   : > { %v1293_v6 = vsub.s32 4, %v263_v1  ;;  %v1295_v7 = vsub.s32 5, %v263_v1  ;;  %v1315_v18 = vsub.s32 6, %v263_v1  ;;  %v1317_v19 = vsub.s32 7, %v263_v1  ;;  %1860 = vst [vmem:[#allocation15_spill] sm:$0xff] %v1351_v39  ;;  %v1354_v40 = vld [vmem:[%s1279_s19 + $0x80] sm:$0xff] }
  0x45   : > { %v265_v12 = vrot.slane %v222_v8, %v1285_v2  ;;  %v289_v13 = vrot.slane %v222_v8, %v1287_v3  ;;  %v321_v14 = vrot.slane %v222_v8, %v1289_v4  ;;  %v353_v15 = vrot.slane %v222_v8, %v1291_v5  ;;  %1861 = vst [vmem:[#allocation16_spill] sm:$0xff] %v1354_v40  ;;  %v1357_v41 = vld [vmem:[%s1279_s19 + $0x90] sm:$0xff]  ;;  %v1372_v46 = vld [vmem:[%s1279_s19 + $0x38] sm:$0xff]  ;;  %v1375_v47 = vld [vmem:[%s1279_s19 + $0xa0] sm:$0xff]  ;;  %p1051_p0 = pnand %p1050_p8, %p1208_p9  ;;  %s1053_s30 = sshll.u32 %s1139_s12, 4  ;;  %s1054_s30 = int_to_ptr.vmem [resolvable:$false] %s1053_s30 }
  0x46   : > { %1856 = vst [vmem:[#allocation11_spill] sm:$0xff] %v1293_v6  ;;  %v385_v17 = vrot.slane %v222_v8, %v1293_v6  ;;  %v417_v23 = vrot.slane %v222_v8, %v1295_v7  ;;  %v449_v29 = vrot.slane %v222_v8, %v1315_v18  ;;  %v1333_v30 = vrot.slane %v222_v8, %v1317_v19  ;;  %v1378_v48 = vld [vmem:[%s1279_s19 + $0xb0] sm:$0xff]  ;;  %v1381_v49 = vld [vmem:[%s1279_s19 + $0xc0] sm:$0xff]  ;;  %v1398_v58 = vld [vmem:[%s1279_s19 + $0x48] sm:$0xff]  ;;  %s1055_s4 = scalar_lea.vmem %s1054_s30, 2048  ;;  %p1056_p5 = scmp.lt.s32.totalorder %s1750_s27, %s1054_s30 }
  0x47   : > { %v278_v20 = vmul.f32 %v265_v12, %v1299_v9  ;;  %v302_v21 = vmul.f32 %v289_v13, %v1302_v10  ;;  %v334_v22 = vmul.f32 %v321_v14, %v1305_v11  ;;  %v366_v28 = vmul.f32 %v353_v15, %v1312_v16  ;;  %1862 = vst [vmem:[#allocation17_spill] sm:$0xff] %v1357_v41  ;;  %v1389_v54 = vld [vmem:[%s1279_s19 + $0xd0] sm:$0xff]  ;;  %v1402_v60 = vld [vmem:[%s1279_s19 + $0xe0] sm:$0xff]  ;;  %v1406_v63 = vld [vmem:[%s1279_s19 + $0x58] sm:$0xff]  ;;  %p1052_p2 = pneg %p1051_p0  ;;  %p1057_p6 = scmp.lt.s32.totalorder %s1055_s4, %s1049_s16 }
  0x48   : > { %v398_v36 = vmul.f32 %v385_v17, %v1325_v25  ;;  %v430_v37 = vmul.f32 %v417_v23, %v1328_v26  ;;  %v513_v38 = vrot.slane %v223_v24, %v1285_v2  ;;  %v1360_v42 = vrot.slane %v223_v24, %v1287_v3  ;;  %1863 = vst [vmem:[#allocation18_spill] sm:$0xff] %v1375_v47  ;;  %v224_v8 = vld [vmem:[%s1271_s28 + $0x10] sm:$0xff] }
  0x49   : > { %v310_v27 = vadd.f32 %v302_v21, %v278_v20  ;;  %v1363_v43 = vrot.slane %v223_v24, %v1289_v4  ;;  %v1366_v44 = vrot.slane %v223_v24, %v1291_v5  ;;  %v1369_v45 = vrot.slane %v223_v24, %v1293_v6  ;;  %1864 = vst [vmem:[#allocation19_spill] sm:$0xff] %v1378_v48  ;;  %p1058_p4 = por %p1057_p6, %p1056_p5 }
  0x4a   : > { %1865 = vst [vmem:[#allocation20_spill] sm:$0xff] %v1381_v49  ;;  %v1384_v51 = vrot.slane %v223_v24, %v1295_v7  ;;  %v279_v52 = vmul.f32 %v265_v12, %v1336_v31  ;;  %v303_v53 = vmul.f32 %v289_v13, %v1339_v32  ;;  %1866 = vst [vmem:[#allocation21_spill] sm:$0xff] %v1389_v54 }
  0x4b   : > { %v342_v35 = vadd.f32 %v334_v22, %v310_v27  ;;  %v462_v55 = vmul.f32 %v449_v29, %v1342_v33  ;;  %v494_v56 = vmul.f32 %v1333_v30, %v1345_v34  ;;  %v1395_v57 = vrot.slane %v223_v24, %v1315_v18  ;;  %1867 = vst [vmem:[#allocation22_spill] sm:$0xff] %v1398_v58  ;;  %v1427_v22 = vld [vmem:[%s1279_s19 + $0x68] sm:$0xff]  ;;  %p1059_p7 = pnand %p1058_p4, %p1052_p2 }
  0x4c   : > { %v335_v59 = vmul.f32 %v321_v14, %v1351_v39  ;;  %1868 = vst [vmem:[#allocation23_spill] sm:$0xff] %v1402_v60  ;;  %v526_v62 = vmul.f32 %v513_v38, %v1354_v40  ;;  %1869 = vst [vmem:[#allocation24_spill] sm:$0xff] %v1406_v63  ;;  %v311_v0 = vadd.f32 %v303_v53, %v279_v52  ;;  %v1438_v52 = vld [vmem:[%s1279_s19 + $0xf0] sm:$0xff] }
  0x4d   : > { %v374_v50 = vadd.f32 %v366_v28, %v342_v35  ;;  %v367_v1 = vmul.f32 %v353_v15, %v1372_v46  ;;  %v558_v12 = vmul.f32 %v1360_v42, %v1357_v41  ;;  %v590_v13 = vmul.f32 %v1363_v43, %v1375_v47  ;;  %1870 = vst [vmem:[#allocation25_spill] sm:$0xff] %v1427_v22 }
  0x4e   : > { %v1416_v14 = vmul.f32 %v1366_v44, %v1378_v48  ;;  %v1420_v20 = vmul.f32 %v1369_v45, %v1381_v49  ;;  %v1424_v15 = vmul.f32 %v1384_v51, %v1389_v54  ;;  %v343_v27 = vadd.f32 %v335_v59, %v311_v0  ;;  %1872 = vst [vmem:[#allocation27_spill] sm:$0xff] %v1438_v52  ;;  %v1444_v59 = vld [vmem:[%s1279_s19 + $0x88] sm:$0xff] }
  0x4f   : > { %v406_v61 = vadd.f32 %v398_v36, %v374_v50  ;;  %v399_v28 = vmul.f32 %v385_v17, %v1398_v58  ;;  %v1432_v35 = vmul.f32 %v1395_v57, %v1402_v60  ;;  %v737_v36 = vrot.slane %v223_v24, %v1317_v19  ;;  %1874 = vst [vmem:[#allocation29_spill] sm:$0xff] %v1444_v59  ;;  %v1475_v48 = vld [vmem:[%s1279_s19 + $0xc8] sm:$0xff] }
  0x50   : > { %v431_v50 = vmul.f32 %v417_v23, %v1406_v63  ;;  %v375_v17 = vadd.f32 %v367_v1, %v343_v27  ;;  %v293_v0 = vrot.slane %v224_v8, %v1287_v3  ;;  %v325_v60 = vrot.slane %v224_v8, %v1289_v4  ;;  %v1458_v1 = vld [vmem:[%s1279_s19 + $0xa8] sm:$0xff]  ;;  %v1461_v27 = vld [vmem:[%s1279_s19 + $0xb8] sm:$0xff] }
  0x51   : > { %v438_v21 = vadd.f32 %v430_v37, %v406_v61  ;;  %1871 = vst [vmem:[#allocation26_spill] sm:$0xff] %v1432_v35  ;;  %v269_v37 = vrot.slane %v224_v8, %v1285_v2  ;;  %v1441_v61 = vld [vmem:[%s1279_s19 + $0x78] sm:$0xff]  ;;  %v463_v24 = vmul.f32 %v449_v29, %v1427_v22  ;;  %v357_v54 = vrot.slane %v224_v8, %v1291_v5 }
  0x52   : > { %1873 = vst [vmem:[#allocation28_spill] sm:$0xff] %v1441_v61  ;;  %v1452_v63 = vrot.slane %v224_v8, %v1293_v6  ;;  %1875 = vst [vmem:[#allocation30_spill] sm:$0xff] %v1461_v27  ;;  %v407_v49 = vadd.f32 %v399_v28, %v375_v17  ;;  %v304_v29 = vmul.f32 %v293_v0, %v1302_v10  ;;  %v1478_v28 = vld [vmem:[%s1279_s19 + $0xd8] sm:$0xff] }
  0x53   : > { %v470_v53 = vadd.f32 %v462_v55, %v438_v21  ;;  %v280_v23 = vmul.f32 %v269_v37, %v1299_v9  ;;  %v1455_v21 = vld [vmem:[%s1279_s19 + $0x98] sm:$0xff]  ;;  %v336_v22 = vmul.f32 %v325_v60, %v1305_v11  ;;  %v1466_v9 = vmul.f32 %v737_v36, %v1438_v52  ;;  %1877 = vst [vmem:[#allocation32_spill] sm:$0xff] %v1478_v28 }
  0x54   : > { %v495_v35 = vmul.f32 %v1333_v30, %v1441_v61  ;;  %v439_v17 = vadd.f32 %v431_v50, %v407_v49  ;;  %v225_v11 = vld [vmem:[%s1271_s28 + $0x18] sm:$0xff]  ;;  %v368_v52 = vmul.f32 %v357_v54, %v1312_v16  ;;  %v591_v30 = vmul.f32 %v1363_v43, %v1458_v1 }
  0x55   : > { %v502_v55 = vadd.f32 %v494_v56, %v470_v53  ;;  %1876 = vst [vmem:[#allocation31_spill] sm:$0xff] %v1466_v9  ;;  %v527_v56 = vmul.f32 %v513_v38, %v1444_v59  ;;  %v1472_v53 = vrot.slane %v224_v8, %v1295_v7  ;;  %v312_v10 = vadd.f32 %v304_v29, %v280_v23  ;;  %v1490_v59 = vld [vmem:[%s1279_s19 + $0xe8] sm:$0xff]  ;;  %v1493_v61 = vld [vmem:[%s1279_s19 + $0xf8] sm:$0xff] }
  0x56   : > { %v559_v9 = vmul.f32 %v1360_v42, %v1455_v21  ;;  %v623_v38 = vmul.f32 %v1366_v44, %v1461_v27  ;;  %1878 = vst [vmem:[#allocation33_spill] sm:$0xff] %v1490_v59  ;;  %1879 = vst [vmem:[#allocation34_spill] sm:$0xff] %v1493_v61  ;;  %v471_v49 = vadd.f32 %v463_v24, %v439_v17 }
  0x57   : > { %v534_v58 = vadd.f32 %v526_v62, %v502_v55  ;;  %v453_v62 = vrot.slane %v224_v8, %v1315_v18  ;;  %v344_v50 = vadd.f32 %v336_v22, %v312_v10  ;;  %v400_v23 = vmul.f32 %v1452_v63, %v1325_v25 }
  0x58   : > { %v655_v42 = vmul.f32 %v1369_v45, %v1475_v48  ;;  %v687_v43 = vmul.f32 %v1384_v51, %v1478_v28  ;;  %v485_v44 = vrot.slane %v224_v8, %v1317_v19  ;;  %v1503_v29 = vrot.slane %v225_v11, %v1285_v2 }
  0x59   : > { %v566_v55 = vadd.f32 %v558_v12, %v534_v58  ;;  %v503_v12 = vadd.f32 %v495_v35, %v471_v49  ;;  %v376_v27 = vadd.f32 %v368_v52, %v344_v50  ;;  %v432_v10 = vmul.f32 %v1472_v53, %v1328_v26 }
  0x5a   : > { %v719_v22 = vmul.f32 %v1395_v57, %v1490_v59  ;;  %v751_v45 = vmul.f32 %v737_v36, %v1493_v61  ;;  %v464_v24 = vmul.f32 %v453_v62, %v1342_v33  ;;  %v1512_v51 = vrot.slane %v225_v11, %v1287_v3 }
  0x5b   : > { %v598_v58 = vadd.f32 %v590_v13, %v566_v55  ;;  %v535_v17 = vadd.f32 %v527_v56, %v503_v12  ;;  %v408_v13 = vadd.f32 %v400_v23, %v376_v27  ;;  %v1516_v35 = vrot.slane %v225_v11, %v1289_v4 }
  0x5c   : > { %v496_v52 = vmul.f32 %v485_v44, %v1345_v34  ;;  %v528_v55 = vmul.f32 %v1503_v29, %v1354_v40  ;;  %v1522_v57 = vrot.slane %v225_v11, %v1291_v5  ;;  %v281_v36 = vmul.f32 %v269_v37, %v1336_v31 }
  0x5d   : > { %v630_v8 = vadd.f32 %v1416_v14, %v598_v58  ;;  %v567_v50 = vadd.f32 %v559_v9, %v535_v17  ;;  %v440_v61 = vadd.f32 %v432_v10, %v408_v13  ;;  %v305_v14 = vmul.f32 %v293_v0, %v1339_v32  ;;  %v1880_v0 = vld [vmem:[#allocation19_spill] sm:$0xff]  ;;  %v1881_v17 = vld [vmem:[#allocation22_spill] sm:$0xff] }
  0x5e   : > { %v560_v27 = vmul.f32 %v1512_v51, %v1357_v41  ;;  %v1530_v56 = vrot.slane %v225_v11, %v1293_v6  ;;  %v337_v23 = vmul.f32 %v325_v60, %v1351_v39  ;;  %v369_v58 = vmul.f32 %v357_v54, %v1372_v46  ;;  %v1882_v41 = vld [vmem:[#allocation26_spill] sm:$0xff] }
  0x5f   : > { %v662_v49 = vadd.f32 %v1420_v20, %v630_v8  ;;  %v599_v37 = vadd.f32 %v591_v30, %v567_v50  ;;  %v472_v59 = vadd.f32 %v464_v24, %v440_v61  ;;  %v313_v20 = vadd.f32 %v305_v14, %v281_v36  ;;  %v226_v30 = vld [vmem:[%s1271_s28 + $0x20] sm:$0xff]  ;;  %v1883_v61 = vld [vmem:[#allocation20_spill] sm:$0xff] }
  0x60   : > { %v592_v9 = vmul.f32 %v1516_v35, %v1375_v47  ;;  %v624_v10 = vmul.f32 %v1522_v57, %v1880_v0  ;;  %v677_v8 = vrot.slane %v225_v11, %v1295_v7  ;;  %v401_v13 = vmul.f32 %v1452_v63, %v1881_v17  ;;  %v1884_v50 = vld [vmem:[#allocation24_spill] sm:$0xff]  ;;  %v1885_v63 = vld [vmem:[#allocation31_spill] sm:$0xff] }
  0x61   : > { %v694_v12 = vadd.f32 %v1424_v15, %v662_v49  ;;  %v631_v39 = vadd.f32 %v623_v38, %v599_v37  ;;  %v504_v54 = vadd.f32 %v496_v52, %v472_v59  ;;  %v345_v15 = vadd.f32 %v337_v23, %v313_v20  ;;  %v1886_v59 = vld [vmem:[#allocation25_spill] sm:$0xff]  ;;  %v1887_v23 = vld [vmem:[#allocation28_spill] sm:$0xff] }
  0x62   : > { %v656_v24 = vmul.f32 %v1530_v56, %v1883_v61  ;;  %v1547_v36 = vrot.slane %v225_v11, %v1315_v18  ;;  %v1550_v49 = vrot.slane %v225_v11, %v1317_v19  ;;  %v433_v14 = vmul.f32 %v1472_v53, %v1884_v50  ;;  %v1892_v50 = vld [vmem:[#allocation29_spill] sm:$0xff] }
  0x63   : > { %v726_v60 = vadd.f32 %v1882_v41, %v694_v12  ;;  %v663_v41 = vadd.f32 %v655_v42, %v631_v39  ;;  %v536_v38 = vadd.f32 %v528_v55, %v504_v54  ;;  %v377_v12 = vadd.f32 %v369_v58, %v345_v15  ;;  %v1888_v42 = vld [vmem:[#allocation12_spill] sm:$0xff] }
  0x64   : > { %v465_v52 = vmul.f32 %v453_v62, %v1886_v59  ;;  %v497_v37 = vmul.f32 %v485_v44, %v1887_v23  ;;  %v273_v20 = vrot.slane %v226_v30, %v1285_v2  ;;  %v297_v61 = vrot.slane %v226_v30, %v1287_v3  ;;  %v1889_v62 = vld [vmem:[#allocation13_spill] sm:$0xff] }
  0x65   : > { %v758_v17 = vadd.f32 %v1885_v63, %v726_v60  ;;  %v695_v11 = vadd.f32 %v687_v43, %v663_v41  ;;  %v568_v53 = vadd.f32 %v560_v27, %v536_v38  ;;  %v409_v60 = vadd.f32 %v401_v13, %v377_v12  ;;  %v1891_v27 = vld [vmem:[#allocation21_spill] sm:$0xff] }
  0x66   : > { %v329_v39 = vrot.slane %v226_v30, %v1289_v4  ;;  %v282_v55 = vmul.f32 %v273_v20, %v1888_v42  ;;  %v306_v44 = vmul.f32 %v297_v61, %v1889_v62  ;;  %v361_v58 = vrot.slane %v226_v30, %v1291_v5 }
  0x67   : > { %767 = vst.msk [vmem:[%s1561_s21] sm:$0xff] %vm766_vm0, %v758_v17  ;;  %v1570_v54 = vrot.slane %v226_v30, %v1293_v6  ;;  %v727_v15 = vadd.f32 %v719_v22, %v695_v11  ;;  %v600_v63 = vadd.f32 %v592_v9, %v568_v53  ;;  %v441_v23 = vadd.f32 %v433_v14, %v409_v60  ;;  %v1890_v17 = vld [vmem:[#allocation14_spill] sm:$0xff]  ;;  %v227_v22 = vld [vmem:[%s1271_s28 + $0x28] sm:$0xff]  ;;  %v1893_v9 = vld [vmem:[#allocation23_spill] sm:$0xff] }
  0x68   : > { %v338_v43 = vmul.f32 %v329_v39, %v1890_v17  ;;  %v688_v13 = vmul.f32 %v677_v8, %v1891_v27  ;;  %v314_v41 = vadd.f32 %v306_v44, %v282_v55  ;;  %v370_v38 = vmul.f32 %v361_v58, %v1312_v16 }
  0x69   : > { %v1576_v12 = vrot.slane %v226_v30, %v1295_v7  ;;  %v759_v62 = vadd.f32 %v751_v45, %v727_v15  ;;  %v632_v42 = vadd.f32 %v624_v10, %v600_v63  ;;  %v473_v59 = vadd.f32 %v465_v52, %v441_v23 }
  0x6a   : > { %v529_v0 = vmul.f32 %v1503_v29, %v1892_v50  ;;  %v720_v14 = vmul.f32 %v1547_v36, %v1893_v9  ;;  %v346_v11 = vadd.f32 %v338_v43, %v314_v41  ;;  %v402_v53 = vmul.f32 %v1570_v54, %v1325_v25  ;;  %v1894_v29 = vld [vmem:[#allocation27_spill] sm:$0xff] }
  0x6b   : > { %v457_v60 = vrot.slane %v226_v30, %v1315_v18  ;;  %768 = vst.msk [vmem:[%s1561_s21 + $0x8] sm:$0xff] %vm766_vm0, %v759_v62  ;;  %v664_v55 = vadd.f32 %v656_v24, %v632_v42  ;;  %v505_v44 = vadd.f32 %v497_v37, %v473_v59  ;;  %v561_v45 = vmul.f32 %v1512_v51, %v1455_v21  ;;  %v1895_v59 = vld [vmem:[#allocation30_spill] sm:$0xff] }
  0x6c   : > { %v1591_v10 = vrot.slane %v226_v30, %v1317_v19  ;;  %v752_v52 = vmul.f32 %v1550_v49, %v1894_v29  ;;  %v378_v23 = vadd.f32 %v370_v38, %v346_v11  ;;  %v434_v15 = vmul.f32 %v1576_v12, %v1328_v26 }
  0x6d   : > { %v1598_v63 = vrot.slane %v227_v22, %v1285_v2  ;;  %v696_v43 = vadd.f32 %v688_v13, %v664_v55  ;;  %v537_v62 = vadd.f32 %v529_v0, %v505_v44  ;;  %v593_v24 = vmul.f32 %v1516_v35, %v1458_v1 }
  0x6e   : > { %v625_v51 = vmul.f32 %v1522_v57, %v1895_v59  ;;  %v657_v30 = vmul.f32 %v1530_v56, %v1475_v48  ;;  %v689_v37 = vmul.f32 %v677_v8, %v1478_v28  ;;  %v410_v42 = vadd.f32 %v402_v53, %v378_v23  ;;  %v1897_v28 = vld [vmem:[#allocation33_spill] sm:$0xff] }
  0x6f   : > { %v466_v41 = vmul.f32 %v457_v60, %v1342_v33  ;;  %v728_v38 = vadd.f32 %v720_v14, %v696_v43  ;;  %v569_v11 = vadd.f32 %v561_v45, %v537_v62  ;;  %v498_v0 = vmul.f32 %v1591_v10, %v1345_v34  ;;  %v1896_v43 = vld [vmem:[#allocation15_spill] sm:$0xff] }
  0x70   : > { %v1611_v13 = vrot.slane %v227_v22, %v1287_v3  ;;  %v442_v35 = vadd.f32 %v434_v15, %v410_v42  ;;  %v530_v57 = vmul.f32 %v1598_v63, %v1354_v40  ;;  %v1616_v56 = vrot.slane %v227_v22, %v1289_v4 }
  0x71   : > { %v1619_v8 = vrot.slane %v227_v22, %v1291_v5  ;;  %v760_v53 = vadd.f32 %v752_v52, %v728_v38  ;;  %v601_v14 = vadd.f32 %v593_v24, %v569_v11  ;;  %v1622_v55 = vrot.slane %v227_v22, %v1293_v6  ;;  %v1898_v24 = vld [vmem:[#allocation34_spill] sm:$0xff]  ;;  %v1899_v11 = vld [vmem:[#allocation17_spill] sm:$0xff] }
  0x72   : > { %v283_v44 = vmul.f32 %v273_v20, %v1336_v31  ;;  %v474_v45 = vadd.f32 %v466_v41, %v442_v35  ;;  %v1626_v23 = vrot.slane %v227_v22, %v1295_v7  ;;  %v307_v15 = vmul.f32 %v297_v61, %v1339_v32 }
  0x73   : > { %v339_v62 = vmul.f32 %v329_v39, %v1896_v43  ;;  %769 = vst.msk [vmem:[%s1561_s21 + $0x10] sm:$0xff] %vm766_vm0, %v760_v53  ;;  %v633_v42 = vadd.f32 %v625_v51, %v601_v14  ;;  %v721_v52 = vmul.f32 %v1547_v36, %v1897_v28  ;;  %v753_v38 = vmul.f32 %v1550_v49, %v1898_v24  ;;  %v1900_v43 = vld [vmem:[#allocation19_spill] sm:$0xff]  ;;  %v1901_v53 = vld [vmem:[#allocation20_spill] sm:$0xff]  ;;  %v228_v49 = vld [vmem:[%s1271_s28 + $0x30] sm:$0xff] }
  0x74   : > { %v562_v20 = vmul.f32 %v1611_v13, %v1899_v11  ;;  %v506_v41 = vadd.f32 %v498_v0, %v474_v45  ;;  %v594_v35 = vmul.f32 %v1616_v56, %v1375_v47  ;;  %v315_v40 = vadd.f32 %v307_v15, %v283_v44  ;;  %v1902_v47 = vld [vmem:[#allocation22_spill] sm:$0xff]  ;;  %v1903_v15 = vld [vmem:[#allocation24_spill] sm:$0xff] }
  0x75   : > { %v371_v61 = vmul.f32 %v361_v58, %v1372_v46  ;;  %v665_v39 = vadd.f32 %v657_v30, %v633_v42  ;;  %v626_v51 = vmul.f32 %v1619_v8, %v1900_v43  ;;  %v658_v36 = vmul.f32 %v1622_v55, %v1901_v53  ;;  %v1904_v53 = vld [vmem:[#allocation25_spill] sm:$0xff] }
  0x76   : > { %v1646_v14 = vrot.slane %v227_v22, %v1315_v18  ;;  %v538_v24 = vadd.f32 %v530_v57, %v506_v41  ;;  %v690_v0 = vmul.f32 %v1626_v23, %v1891_v27  ;;  %v347_v45 = vadd.f32 %v339_v62, %v315_v40 }
  0x77   : > { %v403_v44 = vmul.f32 %v1570_v54, %v1902_v47  ;;  %v697_v58 = vadd.f32 %v689_v37, %v665_v39  ;;  %v1654_v30 = vrot.slane %v227_v22, %v1317_v19  ;;  %v435_v42 = vmul.f32 %v1576_v12, %v1903_v15  ;;  %v1905_v39 = vld [vmem:[#allocation12_spill] sm:$0xff]  ;;  %v1906_v15 = vld [vmem:[#allocation13_spill] sm:$0xff] }
  0x78   : > { %v467_v43 = vmul.f32 %v457_v60, %v1904_v53  ;;  %v570_v28 = vadd.f32 %v562_v20, %v538_v24  ;;  %v379_v11 = vadd.f32 %v371_v61, %v347_v45  ;;  %v277_v57 = vrot.slane %v228_v49, %v1285_v2  ;;  %v1907_v20 = vld [vmem:[#allocation28_spill] sm:$0xff] }
  0x79   : > { %v301_v41 = vrot.slane %v228_v49, %v1287_v3  ;;  %v729_v27 = vadd.f32 %v721_v52, %v697_v58  ;;  %v333_v40 = vrot.slane %v228_v49, %v1289_v4  ;;  %v365_v54 = vrot.slane %v228_v49, %v1291_v5 }
  0x7a   : > { %v397_v22 = vrot.slane %v228_v49, %v1293_v6  ;;  %v602_v37 = vadd.f32 %v594_v35, %v570_v28  ;;  %v411_v62 = vadd.f32 %v403_v44, %v379_v11  ;;  %v284_v12 = vmul.f32 %v277_v57, %v1905_v39 }
  0x7b   : > { %v308_v60 = vmul.f32 %v301_v41, %v1906_v15  ;;  %v761_v24 = vadd.f32 %v753_v38, %v729_v27  ;;  %v499_v61 = vmul.f32 %v1591_v10, %v1907_v20  ;;  %v340_v52 = vmul.f32 %v333_v40, %v1890_v17  ;;  %v1679_v17 = vld [vmem:[%s1271_s28 + $0x38] sm:$0xff] }
  0x7c   : > { %v372_v45 = vmul.f32 %v365_v54, %v1312_v16  ;;  %v634_v58 = vadd.f32 %v626_v51, %v602_v37  ;;  %v443_v53 = vadd.f32 %v435_v42, %v411_v62  ;;  %v429_v6 = vrot.slane %v228_v49, %v1295_v7 }
  0x7d   : > { %v316_v47 = vadd.f32 %v308_v60, %v284_v12  ;;  %770 = vst.msk [vmem:[%s1561_s21 + $0x18] sm:$0xff] %vm766_vm0, %v761_v24  ;;  %v722_v28 = vmul.f32 %v1646_v14, %v1893_v9  ;;  %v531_v27 = vmul.f32 %v1598_v63, %v1892_v50  ;;  %v404_v38 = vmul.f32 %v397_v22, %v1325_v25 }
  0x7e   : > { %v666_v10 = vadd.f32 %v658_v36, %v634_v58  ;;  %v475_v11 = vadd.f32 %v467_v43, %v443_v53  ;;  %v461_v35 = vrot.slane %v228_v49, %v1315_v18  ;;  %v754_v51 = vmul.f32 %v1654_v30, %v1894_v29 }
  0x7f   : > { %v348_v16 = vadd.f32 %v340_v52, %v316_v47  ;;  %v563_v44 = vmul.f32 %v1611_v13, %v1455_v21  ;;  %v493_v15 = vrot.slane %v228_v49, %v1317_v19  ;;  %v436_v25 = vmul.f32 %v429_v6, %v1328_v26 }
  0x80   : > { %v698_v42 = vadd.f32 %v690_v0, %v666_v10  ;;  %v507_v37 = vadd.f32 %v499_v61, %v475_v11  ;;  %v595_v43 = vmul.f32 %v1616_v56, %v1458_v1  ;;  %v525_v47 = vrot.slane %v1679_v17, %v1285_v2  ;;  %v1908_v61 = vld [vmem:[#allocation15_spill] sm:$0xff] }
  0x81   : > { %v380_v63 = vadd.f32 %v372_v45, %v348_v16  ;;  %v468_v39 = vmul.f32 %v461_v35, %v1342_v33  ;;  %v627_v13 = vmul.f32 %v1619_v8, %v1895_v59  ;;  %v557_v49 = vrot.slane %v1679_v17, %v1287_v3  ;;  %v1909_v45 = vld [vmem:[#allocation16_spill] sm:$0xff]  ;;  %v1913_v16 = vld [vmem:[#allocation22_spill] sm:$0xff] }
  0x82   : > { %v730_v53 = vadd.f32 %v722_v28, %v698_v42  ;;  %v539_v36 = vadd.f32 %v531_v27, %v507_v37  ;;  %v500_v56 = vmul.f32 %v493_v15, %v1345_v34  ;;  %v659_v60 = vmul.f32 %v1622_v55, %v1475_v48  ;;  %v1910_v28 = vld [vmem:[#allocation32_spill] sm:$0xff]  ;;  %v1914_v42 = vld [vmem:[#allocation18_spill] sm:$0xff]  ;;  %v1915_v37 = vld [vmem:[#allocation11_spill] sm:$0xff] }
  0x83   : > { %v412_v62 = vadd.f32 %v404_v38, %v380_v63  ;;  %v285_v2 = vmul.f32 %v277_v57, %v1336_v31  ;;  %v309_v24 = vmul.f32 %v301_v41, %v1339_v32  ;;  %v341_v33 = vmul.f32 %v333_v40, %v1908_v61  ;;  %v1911_v32 = vld [vmem:[#allocation17_spill] sm:$0xff] }
  0x84   : > { %v762_v0 = vadd.f32 %v754_v51, %v730_v53  ;;  %v571_v26 = vadd.f32 %v563_v44, %v539_v36  ;;  %v532_v3 = vmul.f32 %v525_v47, %v1909_v45  ;;  %v589_v58 = vrot.slane %v1679_v17, %v1289_v4  ;;  %v1912_v38 = vld [vmem:[#allocation33_spill] sm:$0xff] }
  0x85   : > { %v444_v12 = vadd.f32 %v436_v25, %v412_v62  ;;  %v691_v34 = vmul.f32 %v1626_v23, %v1910_v28  ;;  %v317_v27 = vadd.f32 %v309_v24, %v285_v2  ;;  %v373_v55 = vmul.f32 %v365_v54, %v1372_v46  ;;  %v1916_v54 = vld [vmem:[#allocation34_spill] sm:$0xff]  ;;  %v1918_v62 = vld [vmem:[#allocation19_spill] sm:$0xff] }
  0x86   : > { %771 = vst.msk [vmem:[%s1561_s21 + $0x20] sm:$0xff] %vm766_vm0, %v762_v0  ;;  %v603_v8 = vadd.f32 %v595_v43, %v571_v26  ;;  %v564_v41 = vmul.f32 %v557_v49, %v1911_v32  ;;  %v621_v40 = vrot.slane %v1679_v17, %v1291_v5  ;;  %v723_v10 = vmul.f32 %v1646_v14, %v1912_v38  ;;  %v1917_v43 = vld [vmem:[#allocation24_spill] sm:$0xff] }
  0x87   : > { %v476_v52 = vadd.f32 %v468_v39, %v444_v12  ;;  %v349_v11 = vadd.f32 %v341_v33, %v317_v27  ;;  %v405_v51 = vmul.f32 %v397_v22, %v1913_v16  ;;  %v596_v23 = vmul.f32 %v589_v58, %v1914_v42  ;;  %v1921_v33 = vld [vmem:[#allocation21_spill] sm:$0xff] }
  0x88   : > { %v635_v31 = vadd.f32 %v627_v13, %v603_v8  ;;  %v653_v46 = vrot.slane %v1679_v17, %v1915_v37  ;;  %v755_v63 = vmul.f32 %v1654_v30, %v1916_v54  ;;  %v437_v53 = vmul.f32 %v429_v6, %v1917_v43  ;;  %v1919_v13 = vld [vmem:[#allocation25_spill] sm:$0xff] }
  0x89   : > { %v508_v57 = vadd.f32 %v500_v56, %v476_v52  ;;  %v381_v25 = vadd.f32 %v373_v55, %v349_v11  ;;  %v628_v14 = vmul.f32 %v621_v40, %v1918_v62  ;;  %v685_v22 = vrot.slane %v1679_v17, %v1295_v7  ;;  %v1920_v56 = vld [vmem:[#allocation20_spill] sm:$0xff] }
  0x8a   : > { %v667_v4 = vadd.f32 %v659_v60, %v635_v31  ;;  %v469_v0 = vmul.f32 %v461_v35, %v1919_v13  ;;  %v660_v60 = vmul.f32 %v653_v46, %v1920_v56  ;;  %v717_v30 = vrot.slane %v1679_v17, %v1315_v18 }
  0x8b   : > { %v540_v44 = vadd.f32 %v532_v3, %v508_v57  ;;  %v413_v39 = vadd.f32 %v405_v51, %v381_v25  ;;  %v501_v6 = vmul.f32 %v493_v15, %v1907_v20  ;;  %v692_v8 = vmul.f32 %v685_v22, %v1921_v33 }
  0x8c   : > { %v699_v5 = vadd.f32 %v691_v34, %v667_v4  ;;  %v749_v7 = vrot.slane %v1679_v17, %v1317_v19  ;;  %v533_v35 = vmul.f32 %v525_v47, %v1892_v50  ;;  %v724_v3 = vmul.f32 %v717_v30, %v1893_v9 }
  0x8d   : > { %v572_v36 = vadd.f32 %v564_v41, %v540_v44  ;;  %v445_v2 = vadd.f32 %v437_v53, %v413_v39  ;;  %v565_v34 = vmul.f32 %v557_v49, %v1455_v21  ;;  %v597_v19 = vmul.f32 %v589_v58, %v1458_v1 }
  0x8e   : > { %v731_v26 = vadd.f32 %v723_v10, %v699_v5  ;;  %v756_v15 = vmul.f32 %v749_v7, %v1894_v29  ;;  %v629_v50 = vmul.f32 %v621_v40, %v1895_v59  ;;  %v661_v9 = vmul.f32 %v653_v46, %v1475_v48 }
  0x8f   : > { %v604_v12 = vadd.f32 %v596_v23, %v572_v36  ;;  %v477_v52 = vadd.f32 %v469_v0, %v445_v2  ;;  %v693_v29 = vmul.f32 %v685_v22, %v1910_v28  ;;  %v725_v57 = vmul.f32 %v717_v30, %v1912_v38 }
  0x90   : > { %v763_v24 = vadd.f32 %v755_v63, %v731_v26  ;;  %v757_v58 = vmul.f32 %v749_v7, %v1916_v54 }
  0x91   : > { %v636_v61 = vadd.f32 %v628_v14, %v604_v12  ;;  %v509_v18 = vadd.f32 %v501_v6, %v477_v52 }
  0x92   : > { %772 = vst.msk [vmem:[%s1561_s21 + $0x28] sm:$0xff] %vm766_vm0, %v763_v24 }
  0x93   : > { %v668_v45 = vadd.f32 %v660_v60, %v636_v61  ;;  %v541_v27 = vadd.f32 %v533_v35, %v509_v18 }
  0x95   : > { %v700_v20 = vadd.f32 %v692_v8, %v668_v45  ;;  %v573_v55 = vadd.f32 %v565_v34, %v541_v27 }
  0x97   : > { %v732_v17 = vadd.f32 %v724_v3, %v700_v20  ;;  %v605_v31 = vadd.f32 %v597_v19, %v573_v55 }
  0x99   : > { %v764_v47 = vadd.f32 %v756_v15, %v732_v17  ;;  %v637_v21 = vadd.f32 %v629_v50, %v605_v31 }
  0x9b   : > { %773 = vst.msk [vmem:[%s1561_s21 + $0x30] sm:$0xff] %vm766_vm0, %v764_v47  ;;  %v669_v49 = vadd.f32 %v661_v9, %v637_v21 }
  0x9d   : > { %v701_v1 = vadd.f32 %v693_v29, %v669_v49 }
  0x9f   : > { %v733_v59 = vadd.f32 %v725_v57, %v701_v1 }
  0xa1   : > { %v765_v48 = vadd.f32 %v757_v58, %v733_v59 }
  0xa3   : > { %774 = vst.msk [vmem:[%s1561_s21 + $0x38] sm:$0xff] %vm766_vm0, %v765_v48 }
  0xa4   : > { %1062 = shalt.err (!%p1059_p7)
}
  0xa5   : > { %s1063_s6 = scalar_lea.hbm %s1755_s8, 1024  ;;  %s1067_s28 = scalar_lea.hbm %s1807_s2, 2048 }
  0xa6   : > { %p1064_p1 = scmp.ne.s32.totalorder %s1755_s8, %s1063_s6  ;;  %p1068_p3 = scmp.lt.s32.totalorder %s1755_s8, %s1807_s2 }
  0xa7   : > { %p1069_p8 = scmp.lt.s32.totalorder %s1067_s28, %s1063_s6 }
  0xa8   : > { %p1065_p10 = pnand %p1064_p1, %p1208_p9 }
  0xa9   : > { %p1070_p0 = por %p1069_p8, %p1068_p3 }
  0xaa   : > { %p1066_p13 = pneg %p1065_p10 }
  0xac   : > { %p1071_p2 = pnand %p1070_p0, %p1066_p13 }
  0xae   : > { %1074 = shalt.err (!%p1071_p2)
}
  0xaf   : > { %s1140_s19 = smov 128   ;;  %s1141_s21 = smov 8  }
  0xb0   : > { %926 = dma.vmem_to_hbm [thread:$0]  (%p1208_p9), %s1750_s27, 1024, %s1755_s8, %s776_s15, %s1140_s19, %s1140_s19, %s1141_s21  }
  0xb1 PF: > { %s805_s29 = sand.u32 1, %s1113_s9   ;;  %p936_p5 = pnand %p903_p12, %p1215_p11 }
  0xb2   : > { %s806_s3 = scalar_lea.sflag [#allocation4], %s805_s29 }
  0xb3   : > { %p937_p6 = pneg %p936_p5 }
  0xb5   : > { %1108 = dma.done.wait (%p937_p6), %s806_s3, 1024  }
  0xb6   : > { %1110 = vsyncadd (%p937_p6), %s806_s3, 4294966272  ;;  %s21_s14 = sadd.s32 1, %s1133_s14   ;;  %s1922_s9 = smov %s1117_s10 }
  0xb7   : > { %p18_p4 = scmp.ge.s32.totalorder %s21_s14, 4   ;;  %s1923_s10 = smov %s1121_s11 }
  0xb8   : > { %s1924_s11 = smov %s1213_s23  ;;  %s1925_s12 = smov %s1129_s13 }
  0xb9   : > { %s1926_s13 = smov %s1928_s17  ;;  %20 = sbr.rel (!%p18_p4) target bundleno = 8 (0x8), region = 86 }
  0xbe   :  { %811 = vsyncpa [#allocation3], 1 }
  0xbf   :  { %813 = vsyncpa [#allocation3 + $0x1], 1 }
  0xc0   :  { %814 = vsyncpa [#allocation6], 1 }
  0xc1   :  { %816 = vsyncpa [#allocation6 + $0x1], 1 }
  0xc2   :  { %817 = vsyncpa [#allocation4], 1 }
  0xc3   :  { %819 = vsyncpa [#allocation4 + $0x1], 1 }

</bundles_post_ra>
